<compile_context>
chip_gen: v7x
topology: tpu7x:2x2x1
jax: 0.10.0
libtpu: 0.0.40
codegen_flags: <defaults>
</compile_context>

<pallas_src>
import jax
import jax.numpy as jnp
from jax.experimental import pallas as pl
from jax.experimental.pallas import tpu as pltpu

# ---- problem sizes (consistent with the PyTorch script) ----
INPUT_SIZE = (16, 16)
D = 16 * 16            # np.prod(input_size) = 256
HIDDEN = 200           # encoder output features (padded to 256 internally)
BATCH = 256            # example batch; must be a multiple of the batch tile
BATCH_TILE = 128       # rows of the MXU M-tile per grid step


def autoencoder_kernel(x_ref, we_ref, be_ref, wd_ref, bd_ref, out_ref):
    """Fused encoder+decoder: out = (x @ We + be) @ Wd + bd.

    Dots run with bf16 inputs on the MXU and f32 accumulation; bias adds and
    the hidden activation stay in f32.
    """
    x = x_ref[...].astype(jnp.bfloat16)                        # (TB, D)
    # encoder: (TB, D) @ (D, Hp) -> (TB, Hp), f32 accumulation
    h = jnp.dot(x, we_ref[...], preferred_element_type=jnp.float32)
    h = h + be_ref[...]                                        # f32 bias add
    # decoder: (TB, Hp) @ (Hp, D) -> (TB, D), f32 accumulation
    o = jnp.dot(h.astype(jnp.bfloat16), wd_ref[...],
                preferred_element_type=jnp.float32)
    o = o + bd_ref[...]                                        # f32 bias add
    out_ref[...] = o.astype(out_ref.dtype)


def autoencoder_forward(x, we, be, wd, bd, epoch=None, *, batch_tile=BATCH_TILE):
    """x: (B, D) float32.  we: (D, H), be: (1, H), wd: (H, D), bd: (1, D).

    Returns (B, D) float32.  `epoch` is ignored (matches the PyTorch module).
    """
    del epoch
    B, Din = x.shape
    H = we.shape[1]

    # Zero-pad the hidden dim to a lane multiple (200 -> 256).  The padded
    # We columns / be entries / Wd rows are zero, so the result is unchanged.
    Hp = ((H + 127) // 128) * 128
    if Hp != H:
        we = jnp.pad(we, ((0, 0), (0, Hp - H)))
        be = jnp.pad(be, ((0, 0), (0, Hp - H)))
        wd = jnp.pad(wd, ((0, Hp - H), (0, 0)))

    # bf16 weights (MXU-native, half the DMA bytes); f32 biases.
    we = we.astype(jnp.bfloat16)
    wd = wd.astype(jnp.bfloat16)
    be = be.astype(jnp.float32)
    bd = bd.astype(jnp.float32)

    tb = min(batch_tile, B)
    assert B % tb == 0, "batch must be a multiple of the batch tile"
    grid = (B // tb,)

    cost = pl.CostEstimate(
        flops=2 * B * Din * Hp + 2 * B * Hp * Din,
        transcendentals=0,
        bytes_accessed=(x.size * x.dtype.itemsize
                        + we.size * 2 + wd.size * 2
                        + be.size * 4 + bd.size * 4
                        + B * Din * 4),
    )

    return pl.pallas_call(
        autoencoder_kernel,
        out_shape=jax.ShapeDtypeStruct((B, Din), x.dtype),
        grid_spec=pltpu.PrefetchScalarGridSpec(
            num_scalar_prefetch=0,
            grid=grid,
            in_specs=[
                # batch-tiled activations
                pl.BlockSpec((tb, Din), lambda i: (i, 0)),
                # parameters: same block every step -> VMEM-resident weights
                pl.BlockSpec((Din, Hp), lambda i: (0, 0)),
                pl.BlockSpec((1, Hp), lambda i: (0, 0)),
                pl.BlockSpec((Hp, Din), lambda i: (0, 0)),
                pl.BlockSpec((1, Din), lambda i: (0, 0)),
            ],
            out_specs=pl.BlockSpec((tb, Din), lambda i: (i, 0)),
        ),
        compiler_params=pltpu.CompilerParams(
            dimension_semantics=("parallel",),
        ),
        cost_estimate=cost,
    )(x, we, be, wd, bd)


def init_params(key, d, h):
    """Deterministic parameter init (PyTorch-Linear-style uniform fan-in bounds).

    Stored pre-transposed for the kernel: We (d, h), Wd (h, d); biases (1, .).
    """
    k1, k2, k3, k4 = jax.random.split(key, 4)
    bound_e = 1.0 / jnp.sqrt(d)
    bound_d = 1.0 / jnp.sqrt(h)
    we = jax.random.uniform(k1, (d, h), jnp.float32, -bound_e, bound_e)
    be = jax.random.uniform(k2, (1, h), jnp.float32, -bound_e, bound_e)
    wd = jax.random.uniform(k3, (h, d), jnp.float32, -bound_d, bound_d)
    bd = jax.random.uniform(k4, (1, d), jnp.float32, -bound_d, bound_d)
    return we, be, wd, bd


def reference_forward(x, we, be, wd, bd):
    """Precision-matched plain-JAX reference (bf16 MXU inputs, f32 accumulate)."""
    h = jnp.dot(x.astype(jnp.bfloat16), we.astype(jnp.bfloat16),
                preferred_element_type=jnp.float32) + be.astype(jnp.float32)
    o = jnp.dot(h.astype(jnp.bfloat16), wd.astype(jnp.bfloat16),
                preferred_element_type=jnp.float32) + bd.astype(jnp.float32)
    return o


if __name__ == "__main__":
    key = jax.random.PRNGKey(0)
    kx, kp = jax.random.split(key)

    # x corresponds to a batch of flattened 16x16 inputs.
    x = jax.random.normal(kx, (BATCH, D), jnp.float32)
    we, be, wd, bd = init_params(kp, D, HIDDEN)

    out = autoencoder_forward(x, we, be, wd, bd, epoch=0)
    out = jax.block_until_ready(out)
    assert out.shape == (BATCH, D)
    assert out.dtype == jnp.float32

    # Check against a precision-matched JAX reference (same bf16/f32 path).
    ref = reference_forward(x, we, be, wd, bd)
    assert jnp.allclose(out, ref, atol=2e-2, rtol=2e-2), (
        "max abs diff vs matched-precision reference: "
        f"{float(jnp.max(jnp.abs(out - ref)))}")

    # Sanity: stays close to the full-f32 math as well (bf16 weight rounding).
    ref_f32 = (x @ we + be) @ wd + bd
    assert float(jnp.max(jnp.abs(out - ref_f32))) < 0.1

    print("KERNEL_OK")
</pallas_src>

<mosaic_0001>
module attributes {stable_mosaic.version = 11 : i64} {
  func.func @autoencoder_kernel(%arg0: i32, %arg1: memref<128x256xf32, #tpu.memory_space<vmem>>, %arg2: memref<256x256xbf16, #tpu.memory_space<vmem>>, %arg3: memref<1x256xf32, #tpu.memory_space<vmem>>, %arg4: memref<256x256xbf16, #tpu.memory_space<vmem>>, %arg5: memref<1x256xf32, #tpu.memory_space<vmem>>, %arg6: memref<128x256xf32, #tpu.memory_space<vmem>>) attributes {dimension_semantics = [#tpu.dimension_semantics<parallel>], iteration_bounds = array<i64: 2>, scalar_prefetch = 0 : i64, scratch_operands = 0 : i64, tpu.core_type = #tpu.core_type<tc>, window_params = [{transform_indices = @transform_0, window_bounds = array<i64: 128, 256>}, {pipeline_mode = #tpu.pipeline_mode<synchronous>, transform_indices = @transform_1, window_bounds = array<i64: 256, 256>}, {pipeline_mode = #tpu.pipeline_mode<synchronous>, transform_indices = @transform_2, window_bounds = array<i64: 1, 256>}, {pipeline_mode = #tpu.pipeline_mode<synchronous>, transform_indices = @transform_3, window_bounds = array<i64: 256, 256>}, {pipeline_mode = #tpu.pipeline_mode<synchronous>, transform_indices = @transform_4, window_bounds = array<i64: 1, 256>}, {transform_indices = @transform_5, window_bounds = array<i64: 128, 256>}]} {
    %c0 = arith.constant 0 : index
    %c0_0 = arith.constant 0 : index
    %0 = vector.load %arg1[%c0, %c0_0] : memref<128x256xf32, #tpu.memory_space<vmem>>, vector<128x256xf32>
    %1 = arith.truncf %0 : vector<128x256xf32> to vector<128x256xbf16>
    %c0_1 = arith.constant 0 : index
    %c0_2 = arith.constant 0 : index
    %2 = vector.load %arg2[%c0_1, %c0_2] : memref<256x256xbf16, #tpu.memory_space<vmem>>, vector<256x256xbf16>
    %cst = arith.constant dense<0.000000e+00> : vector<128x256xf32>
    %3 = tpu.matmul %1, %2, %cst {dimension_numbers = #tpu.dot_dimension_numbers<[1], [0], [0], [1], [0, 0, 1, 1], [], []>} : vector<128x256xbf16>, vector<256x256xbf16>, vector<128x256xf32> -> vector<128x256xf32>
    %c0_3 = arith.constant 0 : index
    %c0_4 = arith.constant 0 : index
    %4 = vector.load %arg3[%c0_3, %c0_4] : memref<1x256xf32, #tpu.memory_space<vmem>>, vector<1x256xf32>
    %5 = vector.broadcast %4 : vector<1x256xf32> to vector<128x256xf32>
    %6 = arith.addf %3, %5 : vector<128x256xf32>
    %7 = arith.truncf %6 : vector<128x256xf32> to vector<128x256xbf16>
    %c0_5 = arith.constant 0 : index
    %c0_6 = arith.constant 0 : index
    %8 = vector.load %arg4[%c0_5, %c0_6] : memref<256x256xbf16, #tpu.memory_space<vmem>>, vector<256x256xbf16>
    %cst_7 = arith.constant dense<0.000000e+00> : vector<128x256xf32>
    %9 = tpu.matmul %7, %8, %cst_7 {dimension_numbers = #tpu.dot_dimension_numbers<[1], [0], [0], [1], [0, 0, 1, 1], [], []>} : vector<128x256xbf16>, vector<256x256xbf16>, vector<128x256xf32> -> vector<128x256xf32>
    %c0_8 = arith.constant 0 : index
    %c0_9 = arith.constant 0 : index
    %10 = vector.load %arg5[%c0_8, %c0_9] : memref<1x256xf32, #tpu.memory_space<vmem>>, vector<1x256xf32>
    %11 = vector.broadcast %10 : vector<1x256xf32> to vector<128x256xf32>
    %12 = arith.addf %9, %11 : vector<128x256xf32>
    %c0_10 = arith.constant 0 : index
    %c0_11 = arith.constant 0 : index
    %13 = vector.load %arg6[%c0_10, %c0_11] : memref<128x256xf32, #tpu.memory_space<vmem>>, vector<128x256xf32>
    tpu.vector_store %arg6[%c0_10, %c0_11], %12 {strides = array<i32>} : memref<128x256xf32, #tpu.memory_space<vmem>>, vector<128x256xf32>,
    return
  }
  func.func @transform_0(%arg0: i32) -> (i32, i32) {
    %c0_i32 = arith.constant 0 : i32
    %c0_i32_0 = arith.constant 0 : i32
    return %arg0, %c0_i32 : i32, i32
  }
  func.func @transform_1(%arg0: i32) -> (i32, i32) {
    %c0_i32 = arith.constant 0 : i32
    %c0_i32_0 = arith.constant 0 : i32
    %c0_i32_1 = arith.constant 0 : i32
    return %c0_i32, %c0_i32_0 : i32, i32
  }
  func.func @transform_2(%arg0: i32) -> (i32, i32) {
    %c0_i32 = arith.constant 0 : i32
    %c0_i32_0 = arith.constant 0 : i32
    %c0_i32_1 = arith.constant 0 : i32
    return %c0_i32, %c0_i32_0 : i32, i32
  }
  func.func @transform_3(%arg0: i32) -> (i32, i32) {
    %c0_i32 = arith.constant 0 : i32
    %c0_i32_0 = arith.constant 0 : i32
    %c0_i32_1 = arith.constant 0 : i32
    return %c0_i32, %c0_i32_0 : i32, i32
  }
  func.func @transform_4(%arg0: i32) -> (i32, i32) {
    %c0_i32 = arith.constant 0 : i32
    %c0_i32_0 = arith.constant 0 : i32
    %c0_i32_1 = arith.constant 0 : i32
    return %c0_i32, %c0_i32_0 : i32, i32
  }
  func.func @transform_5(%arg0: i32) -> (i32, i32) {
    %c0_i32 = arith.constant 0 : i32
    %c0_i32_0 = arith.constant 0 : i32
    return %arg0, %c0_i32 : i32, i32
  }
}

</mosaic_0001>

<bundles_post_ra>
// kernel: tpu_custom_call.1
= control target key start
LH: loop header
LB: loop body
LE: loop exit
PB: predicated region body
PF: predicated region fallthrough
CT: control target
= control target key end

     0   :  { %10 = vsyncpa [#allocation3], 0  ;;  %s1964_s0 = inlined_call_operand.hbm [shape: f32[256,256], index: 0, kind: input, shape index: {}]   ;;  %s1965_s1 = inlined_call_operand.hbm [shape: bf16[256,256], index: 1, kind: input, shape index: {}]   ;;  %s1966_s2 = inlined_call_operand.vmem [shape: f32[1,256], index: 2, kind: input, shape index: {}]   ;;  %s1967_s3 = inlined_call_operand.hbm [shape: bf16[256,256], index: 3, kind: input, shape index: {}]   ;;  %s1968_s4 = inlined_call_operand.vmem [shape: f32[1,256], index: 4, kind: input, shape index: {}]   ;;  %s1969_s5 = inlined_call_operand.hbm [shape: f32[256,256], index: 5, kind: output, shape index: {}]  }
   0x1   :  { %12 = vsyncpa [#allocation3 + $0x1], 0 }
   0x2   :  { %13 = vsyncpa [#allocation6], 0 }
   0x3   :  { %14 = vsyncpa [#allocation4], 0 }
   0x4   :  { %16 = vsyncpa [#allocation4 + $0x1], 0  ;;  %s1567_s18 = smov 0   ;;  %s1569_s19 = smov 0  }
   0x5   :  { %s1571_s20 = smov 0   ;;  %s1573_s21 = smov 0  }
   0x6 LB: > { %s1588_s22 = sadd.s32 4294967295, %s1525_s21   ;;  %s1112_s23 = sadd.s32 4294967294, %s1525_s21   ;;  %s1525_s21 = sphi %s1573_s21, %s1989_s21   ;;  %s1521_s20 = sphi %s1571_s20, %s1988_s20   ;;  %s1517_s19 = sphi %s1569_s19, %s1987_s19   ;;  %s1513_s18 = sphi %s1567_s18, %s1986_s18  }
   0x7   : > { %p42_p0 = scmp.ne.s32.totalorder %s1517_s19, %s1513_s18  ;;  %p1970_p1 = scmp.eq.s32.totalorder %s1588_s22, 0 }
   0x8   : > { %p156_p3 = scmp.eq.s32.totalorder %s1112_s23, 1  ;;  %p1113_p5 = scmp.ge.s32.totalorder %s1525_s21, 1 }
   0x9   : > { %p1597_p4 = por %p1970_p1, %p42_p0  ;;  %p163_p7 = scmp.lt.s32.totalorder %s1525_s21, 3 }
   0xa   : > { %p1602_p6 = por %p156_p3, %p42_p0  ;;  %s1527_s27 = smov [#allocation5]  }
   0xb   : > { %s1973_s24 = scalar_select %p1597_p4, 1, 0 }
   0xc   : > { %s1974_s25 = scalar_select %p1602_p6, 1, 0 }
   0xd   : > { %p1607_p8 = pnand %p1113_p5, %p163_p7  ;;  %s175_s28 = sshll.u32 %s1527_s27, 4  ;;  %s1611_s28 = int_to_ptr.vmem [resolvable:$true] %s175_s28 }
   0xe   : > { %s1528_s30 = smov [#allocation7]   ;;  %s1369_s9 = scalar_lea.hbm %s1965_s1, 4096 }
   0xf   : > { %p1212_p9 = pneg %p1607_p8  ;;  %s191_s6 = sshll.u32 %s1528_s30, 4  ;;  %s1622_s6 = int_to_ptr.vmem [resolvable:$true] %s191_s6 }
  0x10   : > { %p1370_p12 = scmp.ne.s32.totalorder %s1965_s1, %s1369_s9  ;;  %p1376_p5 = scmp.lt.u32.totalorder %s1369_s9, %s1965_s1 }
  0x11   : > { %p1618_p11 = pnand %p1212_p9, %p1970_p1 }
  0x13   : > { %p1371_p13 = pneg %p1618_p11 }
  0x15   : > { %p1372_p0 = pnand %p1371_p13, %p1370_p12 }
  0x17   : > { %p1373_p3 = pneg %p1372_p0 }
  0x19   : > { %p1378_p7 = pnand %p1376_p5, %p1373_p3 }
  0x1b   : > { %1381 = shalt.err (!%p1378_p7)
}
  0x1c   : > { %s1382_s14 = scalar_lea.vmem %s1611_s28, 4096  ;;  %p1390_p2 = scmp.lt.s32.totalorder %s1611_s28, %s1611_s28 }
  0x1d   : > { %p1383_p9 = scmp.ne.s32.totalorder %s1611_s28, %s1382_s14  ;;  %p1391_p12 = scmp.lt.s32.totalorder %s1382_s14, %s1382_s14 }
  0x1f   : > { %p1385_p10 = pnand %p1383_p9, %p1371_p13  ;;  %p1392_p0 = por %p1391_p12, %p1390_p2 }
  0x21   : > { %p1386_p1 = pneg %p1385_p10 }
  0x23   : > { %p1393_p6 = pnand %p1392_p0, %p1386_p1 }
  0x25   : > { %1396 = shalt.err (!%p1393_p6)
}
  0x26   : > { %s1529_s15 = smov 128   ;;  %s1530_s16 = smov 8  }
  0x27   : > { %1215 = dma.hbm_to_vmem [thread:$0]  (!%p1618_p11), %s1965_s1, 4096, %s1611_s28, [#allocation6], %s1529_s15, %s1529_s15, %s1530_s16  }
  0x28   : > { %s1397_s7 = scalar_lea.hbm %s1967_s3, 4096 }
  0x29   : > { %p1398_p2 = scmp.ne.s32.totalorder %s1967_s3, %s1397_s7  ;;  %p1404_p10 = scmp.lt.u32.totalorder %s1397_s7, %s1967_s3 }
  0x2b   : > { %p1400_p1 = pnand %p1398_p2, %p1371_p13 }
  0x2d   : > { %p1401_p6 = pneg %p1400_p1 }
  0x2f   : > { %p1406_p3 = pnand %p1404_p10, %p1401_p6 }
  0x31   : > { %1409 = shalt.err (!%p1406_p3)
}
  0x32   : > { %s1410_s28 = scalar_lea.vmem %s1622_s6, 4096  ;;  %p1418_p12 = scmp.lt.s32.totalorder %s1622_s6, %s1622_s6 }
  0x33   : > { %p1411_p5 = scmp.ne.s32.totalorder %s1622_s6, %s1410_s28  ;;  %p1419_p0 = scmp.lt.s32.totalorder %s1410_s28, %s1410_s28 }
  0x35   : > { %p1413_p7 = pnand %p1411_p5, %p1371_p13  ;;  %p1420_p2 = por %p1419_p0, %p1418_p12 }
  0x37   : > { %p1414_p9 = pneg %p1413_p7 }
  0x39   : > { %p1421_p1 = pnand %p1420_p2, %p1414_p9 }
  0x3b   : > { %1424 = shalt.err (!%p1421_p1)
}
  0x3c   : > { %1218 = dma.hbm_to_vmem [thread:$0]  (!%p1618_p11), %s1967_s3, 4096, %s1622_s6, [#allocation6], %s1529_s15, %s1529_s15, %s1530_s16  }
  0x3d   : > { %s1677_s14 = sadd.s32 1, %s1525_s21   ;;  %s29_s29 = sadd.s32 1, %s1521_s20 }
  0x3e   : > { %s26_s17 = ssub.s32 %s1525_s21, %s1677_s14  ;;  %p36_p13 = scmp.ne.s32.totalorder %s1521_s20, %s1517_s19 }
  0x3f   : > { %p27_p6 = scmp.eq.s32.totalorder %s26_s17, 0  ;;  %p37_p10 = scmp.eq.s32.totalorder %s1525_s21, 0 }
  0x40   : > { %p1977_p3 = scmp.eq.s32.totalorder %s1588_s22, 1  ;;  %p1229_p7 = scmp.lt.s32.totalorder %s1525_s21, 2 }
  0x41   : > { %s1693_s27 = scalar_select %p27_p6, %s1521_s20, %s29_s29  }
  0x42   : > { %p1687_p5 = por %p1977_p3, %p36_p13  ;;  %p38_p9 = por %p37_p10, %p36_p13 }
  0x43   : > { %s208_s30 = sand.u32 1, %s1521_s20   ;;  %s1197_s6 = sshll.u32 %s1525_s21, 12 }
  0x44   : > { %s1978_s23 = scalar_select %p1687_p5, 1, 0 }
  0x45   : > { %s1117_s7 = sshll.u32 %s208_s30, 8  ;;  %s1700_s8 = scalar_lea.hbm %s1964_s0, %s1197_s6 }
  0x46   : > { %s212_s9 = scalar_lea.vmem [#allocation2], %s1117_s7  ;;  %p1704_p11 = pnand %p1229_p7, %p38_p9 }
  0x47   : > { %s220_s10 = sshll.u32 %s212_s9, 4  ;;  %s1708_s28 = scalar_lea.sflag [#allocation3], %s208_s30  ;;  %s1702_s10 = int_to_ptr.vmem [resolvable:$true] %s220_s10 }
  0x48   : > { %s1425_s12 = scalar_lea.hbm %s1700_s8, 4096  ;;  %p1427_p0 = pneg %p1704_p11 }
  0x49   : > { %p1426_p12 = scmp.ne.s32.totalorder %s1700_s8, %s1425_s12  ;;  %s1430_s17 = scalar_lea.hbm %s1964_s0, 8192 }
  0x4a   : > { %p1431_p13 = scmp.lt.u32.totalorder %s1700_s8, %s1964_s0  ;;  %p1432_p6 = scmp.lt.u32.totalorder %s1430_s17, %s1425_s12 }
  0x4b   : > { %p1428_p2 = pnand %p1427_p0, %p1426_p12  ;;  %p1434_p3 = scmp.lt.u32.totalorder %s1425_s12, %s1700_s8 }
  0x4c   : > { %p1433_p10 = por %p1432_p6, %p1431_p13 }
  0x4d   : > { %p1429_p1 = pneg %p1428_p2 }
  0x4e   : > { %p1435_p7 = por %p1434_p3, %p1433_p10 }
  0x50   : > { %p1436_p9 = pnand %p1435_p7, %p1429_p1 }
  0x52   : > { %1439 = shalt.err (!%p1436_p9)
}
  0x53   : > { %s1440_s30 = scalar_lea.vmem %s1702_s10, 4096  ;;  %s1531_s15 = smov [#allocation2]  }
  0x54   : > { %p1441_p12 = scmp.ne.s32.totalorder %s1702_s10, %s1440_s30  ;;  %s1445_s16 = sshll.u32 %s1531_s15, 4  ;;  %s1446_s16 = int_to_ptr.vmem [resolvable:$false] %s1445_s16 }
  0x55   : > { %s1447_s9 = scalar_lea.vmem %s1446_s16, 8192  ;;  %p1448_p4 = scmp.lt.s32.totalorder %s1702_s10, %s1446_s16 }
  0x56   : > { %p1443_p2 = pnand %p1441_p12, %p1427_p0  ;;  %p1449_p13 = scmp.lt.s32.totalorder %s1447_s9, %s1440_s30 }
  0x58   : > { %p1444_p5 = pneg %p1443_p2  ;;  %p1450_p6 = por %p1449_p13, %p1448_p4 }
  0x5a   : > { %p1451_p10 = pnand %p1450_p6, %p1444_p5 }
  0x5c   : > { %1454 = shalt.err (!%p1451_p10)
}
  0x5d   : > { %s1532_s12 = smov 256   ;;  %s1533_s13 = smov 16  }
  0x5e   : > { %1222 = dma.hbm_to_vmem [thread:$0]  (!%p1704_p11), %s1700_s8, 4096, %s1702_s10, %s1708_s28, %s1532_s12, %s1532_s12, %s1533_s13  }
  0x5f   : > { %232 = sbr.rel (%p1607_p8) target bundleno = 679 (0x2a7), region = 40  ;;  %s1739_s29 = sand.u32 (!%p1607_p8), 1, %s1517_s19  }
  0x60   : > { %s1122_s17 = sshll.u32 (!%p1607_p8), %s1739_s29, 8  ;;  %s235_s7 = scalar_lea.sflag (!%p1607_p8), [#allocation3], %s1739_s29 }
  0x61   : > { %s1745_s6 = scalar_lea.vmem (!%p1607_p8), [#allocation2], %s1122_s17  ;;  %p1980_p4 = scmp.ne.s32.totalorder (!%p1607_p8), %s1973_s24, 0 }
  0x66   : > { %1500 = dma.done.wait (%p1980_p4), %s235_s7, 4096  }
  0x67   : > { %1502 = vsyncadd (%p1980_p4), %s235_s7, 4294963200  ;;  %p1981_p5 = scmp.eq.s32.totalorder %s1588_s22, 0 }
  0x69   : > { %1504 = dma.done.wait (%p1981_p5), [#allocation6], 8192   ;;  %p1982_p8 = pmov %p1981_p5 }
  0x6a   : > { %v1273_v0 = vld [vmem:[#allocation5 + $0x4] ss:$8 sps:$4 sm:$0xff]   ;;  %v1275_v1 = vld [vmem:[#allocation5] ss:$8 sps:$4 sm:$0xff]   ;;  %v1276_v2 = vld [vmem:[#allocation5 + $0x14] ss:$8 sps:$4 sm:$0xff]  }
  0x6b   : > { %1506 = vsyncadd (%p1982_p8), [#allocation6], 4294959104  ;;  %527 = vmatprep.subr.bf16.mxu0 %v1273_v0  ;;  %v1278_v3 = vld [vmem:[#allocation5 + $0x10] ss:$8 sps:$4 sm:$0xff]   ;;  %v1279_v4 = vld [vmem:[#allocation5 + $0x24] ss:$8 sps:$4 sm:$0xff]  }
  0x6c   : > { %528 = vmatpush1.bf16.msra.mxu0 %v1275_v1  ;;  %v1281_v5 = vld [vmem:[#allocation5 + $0x20] ss:$8 sps:$4 sm:$0xff]   ;;  %v1282_v6 = vld [vmem:[#allocation5 + $0x34] ss:$8 sps:$4 sm:$0xff]   ;;  %v1284_v7 = vld [vmem:[#allocation5 + $0x30] ss:$8 sps:$4 sm:$0xff]  }
  0x6d   : > { %529 = vmatprep.subr.bf16.mxu0 %v1276_v2  ;;  %v1285_v8 = vld [vmem:[#allocation5 + $0x44] ss:$8 sps:$4 sm:$0xff]   ;;  %v1287_v9 = vld [vmem:[#allocation5 + $0x40] ss:$8 sps:$4 sm:$0xff]   ;;  %v1288_v10 = vld [vmem:[#allocation5 + $0x54] ss:$8 sps:$4 sm:$0xff]  }
  0x6e   : > { %v1290_v11 = vld [vmem:[#allocation5 + $0x50] ss:$8 sps:$4 sm:$0xff]   ;;  %v1291_v12 = vld [vmem:[#allocation5 + $0x64] ss:$8 sps:$4 sm:$0xff]   ;;  %v1293_v16 = vld [vmem:[#allocation5 + $0x60] ss:$8 sps:$4 sm:$0xff]  }
  0x6f   : > { %v276_v13 = vld [vmem:[%s1745_s6 + $0x8] sm:$0xff]  ;;  %v278_v14 = vld [vmem:[%s1745_s6 + $0x18] sm:$0xff]  ;;  %v275_v50 = vld [vmem:[%s1745_s6] sm:$0xff]  ;;  %s1849_s11 = scalar_lea.vmem [#allocation8], %s1122_s17  ;;  %s1199_s28 = sshll.u32 %s1588_s22, 12 }
  0x70   : > { %530 = vmatpush1.bf16.msra.mxu0 %v1278_v3  ;;  %v308_v15 = vpack.c.bf16 %v278_v14, %v276_v13  ;;  %v1294_v17 = vld [vmem:[#allocation5 + $0x74] ss:$8 sps:$4 sm:$0xff]   ;;  %v1296_v18 = vld [vmem:[#allocation5 + $0x70] ss:$8 sps:$4 sm:$0xff]   ;;  %v1297_v19 = vld [vmem:[#allocation5 + $0x84] ss:$8 sps:$4 sm:$0xff]   ;;  %s1914_s9 = scalar_lea.hbm %s1969_s5, %s1199_s28 }
  0x71   : > { %531 = vmatprep.subr.bf16.mxu0 %v1279_v4  ;;  %v1299_v20 = vld [vmem:[#allocation5 + $0x80] ss:$8 sps:$4 sm:$0xff]   ;;  %v1300_v21 = vld [vmem:[#allocation5 + $0x94] ss:$8 sps:$4 sm:$0xff]   ;;  %v1321_v22 = vld [vmem:[#allocation7 + $0x4] ss:$8 sps:$4 sm:$0xff]  }
  0x72   : > { %559 = vmatprep.mubr.bf16.mxu0 %v308_v15  ;;  %v1323_v23 = vld [vmem:[#allocation7] ss:$8 sps:$4 sm:$0xff]   ;;  %v1302_v24 = vld [vmem:[#allocation5 + $0x90] ss:$8 sps:$4 sm:$0xff]   ;;  %860 = vmatprep.subr.bf16.mxu1 %v1321_v22  ;;  %v1324_v25 = vld [vmem:[#allocation7 + $0x14] ss:$8 sps:$4 sm:$0xff]  }
  0x73   : > { %v1303_v26 = vld [vmem:[#allocation5 + $0xa4] ss:$8 sps:$4 sm:$0xff]   ;;  %861 = vmatpush1.bf16.msra.mxu1 %v1323_v23  ;;  %v1326_v27 = vld [vmem:[#allocation7 + $0x10] ss:$8 sps:$4 sm:$0xff]   ;;  %v1305_v29 = vld [vmem:[#allocation5 + $0xa0] ss:$8 sps:$4 sm:$0xff]  }
  0x74   : > { %532 = vmatpush1.bf16.msra.mxu0 %v1281_v5  ;;  %862 = vmatprep.subr.bf16.mxu1 %v1324_v25  ;;  %v1327_v28 = vld [vmem:[#allocation7 + $0x24] ss:$8 sps:$4 sm:$0xff]   ;;  %v1306_v30 = vld [vmem:[#allocation5 + $0xb4] ss:$8 sps:$4 sm:$0xff]   ;;  %v1329_v31 = vld [vmem:[#allocation7 + $0x20] ss:$8 sps:$4 sm:$0xff]  }
  0x75   : > { %533 = vmatprep.subr.bf16.mxu0 %v1282_v6  ;;  %v1330_v32 = vld [vmem:[#allocation7 + $0x34] ss:$8 sps:$4 sm:$0xff]   ;;  %v1308_v33 = vld [vmem:[#allocation5 + $0xb0] ss:$8 sps:$4 sm:$0xff]   ;;  %v1309_v34 = vld [vmem:[#allocation5 + $0xc4] ss:$8 sps:$4 sm:$0xff]  }
  0x76   : > { %v1332_v35 = vld [vmem:[#allocation7 + $0x30] ss:$8 sps:$4 sm:$0xff]   ;;  %v1333_v36 = vld [vmem:[#allocation7 + $0x44] ss:$8 sps:$4 sm:$0xff]   ;;  %v1311_v37 = vld [vmem:[#allocation5 + $0xc0] ss:$8 sps:$4 sm:$0xff]  }
  0x77   : > { %863 = vmatpush1.bf16.msra.mxu1 %v1326_v27  ;;  %v1312_v38 = vld [vmem:[#allocation5 + $0xd4] ss:$8 sps:$4 sm:$0xff]   ;;  %v1335_v39 = vld [vmem:[#allocation7 + $0x40] ss:$8 sps:$4 sm:$0xff]   ;;  %v1314_v41 = vld [vmem:[#allocation5 + $0xd0] ss:$8 sps:$4 sm:$0xff]  }
  0x78   : > { %534 = vmatpush1.bf16.msra.mxu0 %v1284_v7  ;;  %864 = vmatprep.subr.bf16.mxu1 %v1327_v28  ;;  %v1336_v40 = vld [vmem:[#allocation7 + $0x54] ss:$8 sps:$4 sm:$0xff]   ;;  %v1338_v42 = vld [vmem:[#allocation7 + $0x50] ss:$8 sps:$4 sm:$0xff]   ;;  %v1315_v43 = vld [vmem:[#allocation5 + $0xe4] ss:$8 sps:$4 sm:$0xff]  }
  0x79   : > { %535 = vmatprep.subr.bf16.mxu0 %v1285_v8  ;;  %v1339_v44 = vld [vmem:[#allocation7 + $0x64] ss:$8 sps:$4 sm:$0xff]   ;;  %v1317_v45 = vld [vmem:[#allocation5 + $0xe0] ss:$8 sps:$4 sm:$0xff]   ;;  %v1318_v47 = vld [vmem:[#allocation5 + $0xf4] ss:$8 sps:$4 sm:$0xff]  }
  0x7a   : > { %v1341_v46 = vld [vmem:[#allocation7 + $0x60] ss:$8 sps:$4 sm:$0xff]   ;;  %v1342_v48 = vld [vmem:[#allocation7 + $0x74] ss:$8 sps:$4 sm:$0xff]   ;;  %v1320_v49 = vld [vmem:[#allocation5 + $0xf0] ss:$8 sps:$4 sm:$0xff]  }
  0x7b   : > { %865 = vmatpush1.bf16.msra.mxu1 %v1329_v31  ;;  %v277_v51 = vld [vmem:[%s1745_s6 + $0x10] sm:$0xff]  ;;  %v280_v53 = vld [vmem:[%s1745_s6 + $0x28] sm:$0xff]  ;;  %v282_v54 = vld [vmem:[%s1745_s6 + $0x38] sm:$0xff]  ;;  %s1020_s30 = sshll.u32 %s1849_s11, 4  ;;  %s1006_s22 = scalar_lea.sflag [#allocation4], %s1739_s29  ;;  %s1916_s30 = int_to_ptr.vmem [resolvable:$true] %s1020_s30 }
  0x7c   : > { %536 = vmatpush1.bf16.msra.mxu0 %v1287_v9  ;;  %866 = vmatprep.subr.bf16.mxu1 %v1330_v32  ;;  %v1344_v52 = vld [vmem:[#allocation7 + $0x70] ss:$8 sps:$4 sm:$0xff]   ;;  %v1345_v55 = vld [vmem:[#allocation7 + $0x84] ss:$8 sps:$4 sm:$0xff]   ;;  %v307_v56 = vpack.c.bf16 %v277_v51, %v275_v50  ;;  %v310_v57 = vpack.c.bf16 %v282_v54, %v280_v53  ;;  %v1347_v58 = vld [vmem:[#allocation7 + $0x80] ss:$8 sps:$4 sm:$0xff]  }
  0x7d   : > { %537 = vmatprep.subr.bf16.mxu0 %v1288_v10  ;;  %v1348_v59 = vld [vmem:[#allocation7 + $0x94] ss:$8 sps:$4 sm:$0xff]   ;;  %v279_v60 = vld [vmem:[%s1745_s6 + $0x20] sm:$0xff]  ;;  %v1350_v62 = vld [vmem:[#allocation7 + $0x90] ss:$8 sps:$4 sm:$0xff]   ;;  %s1455_s12 = scalar_lea.vmem %s1916_s30, 4096 }
  0x7e   : > { %v281_v61 = vld [vmem:[%s1745_s6 + $0x30] sm:$0xff]  ;;  %v284_v63 = vld [vmem:[%s1745_s6 + $0x48] sm:$0xff]  ;;  %v286_v0 = vld [vmem:[%s1745_s6 + $0x58] sm:$0xff]  ;;  %p1456_p11 = scmp.ne.s32.totalorder %s1916_s30, %s1455_s12  ;;  %p1983_p0 = scmp.ne.s32.totalorder %s1978_s23, 0 }
  0x7f   : > { %867 = vmatpush1.bf16.msra.mxu1 %v1332_v35  ;;  %v1351_v1 = vld [vmem:[#allocation7 + $0xa4] ss:$8 sps:$4 sm:$0xff]   ;;  %v309_v2 = vpack.c.bf16 %v281_v61, %v279_v60  ;;  %v312_v3 = vpack.c.bf16 %v286_v0, %v284_v63  ;;  %v1353_v4 = vld [vmem:[#allocation7 + $0xa0] ss:$8 sps:$4 sm:$0xff]   ;;  %v1354_v5 = vld [vmem:[#allocation7 + $0xb4] ss:$8 sps:$4 sm:$0xff]  }
  0x80   : > { %538 = vmatpush1.bf16.msra.mxu0 %v1290_v11  ;;  %868 = vmatprep.subr.bf16.mxu1 %v1333_v36  ;;  %v283_v6 = vld [vmem:[%s1745_s6 + $0x40] sm:$0xff]  ;;  %v285_v7 = vld [vmem:[%s1745_s6 + $0x50] sm:$0xff]  ;;  %v288_v9 = vld [vmem:[%s1745_s6 + $0x68] sm:$0xff]  ;;  %p1457_p1 = pnand %p1456_p11, %p1983_p0  ;;  %s1534_s13 = smov [#allocation8]  }
  0x81   : > { %539 = vmatprep.subr.bf16.mxu0 %v1291_v12  ;;  %v1356_v8 = vld [vmem:[#allocation7 + $0xb0] ss:$8 sps:$4 sm:$0xff]   ;;  %v1357_v11 = vld [vmem:[#allocation7 + $0xc4] ss:$8 sps:$4 sm:$0xff]   ;;  %v311_v12 = vpack.c.bf16 %v285_v7, %v283_v6  ;;  %v1359_v14 = vld [vmem:[#allocation7 + $0xc0] ss:$8 sps:$4 sm:$0xff]  }
  0x82   : > { %v290_v10 = vld [vmem:[%s1745_s6 + $0x78] sm:$0xff]  ;;  %v291_v23 = vld [vmem:[%s1745_s6 + $0x80] sm:$0xff]  ;;  %v296_v25 = vld [vmem:[%s1745_s6 + $0xa8] sm:$0xff]  ;;  %p1458_p3 = pneg %p1457_p1  ;;  %s1459_s17 = sshll.u32 %s1534_s13, 4  ;;  %s1460_s17 = int_to_ptr.vmem [resolvable:$false] %s1459_s17 }
  0x83   : > { %869 = vmatpush1.bf16.msra.mxu1 %v1335_v39  ;;  %v314_v13 = vpack.c.bf16 %v290_v10, %v288_v9  ;;  %v1360_v15 = vld [vmem:[#allocation7 + $0xd4] ss:$8 sps:$4 sm:$0xff]   ;;  %v300_v31 = vld [vmem:[%s1745_s6 + $0xc8] sm:$0xff]  ;;  %v299_v35 = vld [vmem:[%s1745_s6 + $0xc0] sm:$0xff]  ;;  %s1461_s7 = scalar_lea.vmem %s1460_s17, 8192  ;;  %p1462_p7 = scmp.lt.s32.totalorder %s1916_s30, %s1460_s17 }
  0x84   : > { %540 = vmatpush1.bf16.msra.mxu0 %v1293_v16  ;;  %870 = vmatprep.subr.bf16.mxu1 %v1336_v40  ;;  %v287_v16 = vld [vmem:[%s1745_s6 + $0x60] sm:$0xff]  ;;  %v302_v32 = vld [vmem:[%s1745_s6 + $0xd8] sm:$0xff]  ;;  %v301_v36 = vld [vmem:[%s1745_s6 + $0xd0] sm:$0xff]  ;;  %p1463_p9 = scmp.lt.s32.totalorder %s1461_s7, %s1455_s12 }
  0x85   : > { %541 = vmatprep.subr.bf16.mxu0 %v1294_v17  ;;  %v289_v17 = vld [vmem:[%s1745_s6 + $0x70] sm:$0xff]  ;;  %v319_v39 = vpack.c.bf16 %v301_v36, %v299_v35  ;;  %v355_v51 = vld [vmem:[%s1966_s2] sm:$0x3] }
  0x86   : > { %p1464_p12 = por %p1463_p9, %p1462_p7 }
  0x87   : > { %871 = vmatpush1.bf16.msra.mxu1 %v1338_v42  ;;  %v305_v42 = vld [vmem:[%s1745_s6 + $0xf0] sm:$0xff] }
  0x88   : > { %542 = vmatpush1.bf16.msra.mxu0 %v1296_v18  ;;  %872 = vmatprep.subr.bf16.mxu1 %v1339_v44  ;;  %v1362_v18 = vld [vmem:[#allocation7 + $0xd0] ss:$8 sps:$4 sm:$0xff]   ;;  %v1363_v44 = vld [vmem:[#allocation7 + $0xe4] ss:$8 sps:$4 sm:$0xff]   ;;  %p1465_p2 = pnand %p1464_p12, %p1458_p3 }
  0x89   : > { %543 = vmatprep.subr.bf16.mxu0 %v1297_v19  ;;  %v292_v19 = vld [vmem:[%s1745_s6 + $0x88] sm:$0xff] }
  0x8b   : > { %873 = vmatpush1.bf16.msra.mxu1 %v1341_v46  ;;  %v1366_v46 = vld [vmem:[#allocation7 + $0xf4] ss:$8 sps:$4 sm:$0xff]  }
  0x8c   : > { %544 = vmatpush1.bf16.msra.mxu0 %v1299_v20  ;;  %874 = vmatprep.subr.bf16.mxu1 %v1342_v48  ;;  %v294_v20 = vld [vmem:[%s1745_s6 + $0x98] sm:$0xff]  ;;  %v357_v48 = vlaneseq }
  0x8d   : > { %545 = vmatprep.subr.bf16.mxu0 %v1300_v21  ;;  %v313_v21 = vpack.c.bf16 %v289_v17, %v287_v16  ;;  %v316_v22 = vpack.c.bf16 %v294_v20, %v292_v19 }
  0x8f   : > { %875 = vmatpush1.bf16.msra.mxu1 %v1344_v52 }
  0x90   : > { %546 = vmatpush1.bf16.msra.mxu0 %v1302_v24  ;;  %876 = vmatprep.subr.bf16.mxu1 %v1345_v55  ;;  %v293_v24 = vld [vmem:[%s1745_s6 + $0x90] sm:$0xff] }
  0x91   : > { %547 = vmatprep.subr.bf16.mxu0 %v1303_v26  ;;  %v298_v26 = vld [vmem:[%s1745_s6 + $0xb8] sm:$0xff]  ;;  %v315_v27 = vpack.c.bf16 %v293_v24, %v291_v23 }
  0x92   : > { %v318_v28 = vpack.c.bf16 %v298_v26, %v296_v25 }
  0x93   : > { %877 = vmatpush1.bf16.msra.mxu1 %v1347_v58 }
  0x94   : > { %548 = vmatpush1.bf16.msra.mxu0 %v1305_v29  ;;  %878 = vmatprep.subr.bf16.mxu1 %v1348_v59  ;;  %v295_v29 = vld [vmem:[%s1745_s6 + $0xa0] sm:$0xff] }
  0x95   : > { %549 = vmatprep.subr.bf16.mxu0 %v1306_v30  ;;  %v297_v30 = vld [vmem:[%s1745_s6 + $0xb0] sm:$0xff] }
  0x97   : > { %879 = vmatpush1.bf16.msra.mxu1 %v1350_v62 }
  0x98   : > { %550 = vmatpush1.bf16.msra.mxu0 %v1308_v33  ;;  %880 = vmatprep.subr.bf16.mxu1 %v1351_v1  ;;  %v317_v33 = vpack.c.bf16 %v297_v30, %v295_v29 }
  0x99   : > { %551 = vmatprep.subr.bf16.mxu0 %v1309_v34  ;;  %v320_v34 = vpack.c.bf16 %v302_v32, %v300_v31 }
  0x9b   : > { %881 = vmatpush1.bf16.msra.mxu1 %v1353_v4 }
  0x9c   : > { %552 = vmatpush1.bf16.msra.mxu0 %v1311_v37  ;;  %882 = vmatprep.subr.bf16.mxu1 %v1354_v5  ;;  %v304_v37 = vld [vmem:[%s1745_s6 + $0xe8] sm:$0xff] }
  0x9d   : > { %553 = vmatprep.subr.bf16.mxu0 %v1312_v38  ;;  %v306_v38 = vld [vmem:[%s1745_s6 + $0xf8] sm:$0xff] }
  0x9e   : > { %v322_v40 = vpack.c.bf16 %v306_v38, %v304_v37 }
  0x9f   : > { %883 = vmatpush1.bf16.msra.mxu1 %v1356_v8 }
  0xa0   : > { %554 = vmatpush1.bf16.msra.mxu0 %v1314_v41  ;;  %884 = vmatprep.subr.bf16.mxu1 %v1357_v11  ;;  %v303_v41 = vld [vmem:[%s1745_s6 + $0xe0] sm:$0xff] }
  0xa1   : > { %555 = vmatprep.subr.bf16.mxu0 %v1315_v43  ;;  %v321_v43 = vpack.c.bf16 %v305_v42, %v303_v41 }
  0xa3   : > { %885 = vmatpush1.bf16.msra.mxu1 %v1359_v14 }
  0xa4   : > { %556 = vmatpush1.bf16.msra.mxu0 %v1317_v45  ;;  %886 = vmatprep.subr.bf16.mxu1 %v1360_v15  ;;  %v1365_v45 = vld [vmem:[#allocation7 + $0xe0] ss:$8 sps:$4 sm:$0xff]  }
  0xa5   : > { %557 = vmatprep.subr.bf16.mxu0 %v1318_v47  ;;  %v1368_v47 = vld [vmem:[#allocation7 + $0xf0] ss:$8 sps:$4 sm:$0xff]  }
  0xa7   : > { %887 = vmatpush1.bf16.msra.mxu1 %v1362_v18 }
  0xa8   : > { %558 = vmatpush1.bf16.msra.mxu0 %v1320_v49  ;;  %888 = vmatprep.subr.bf16.mxu1 %v1363_v44  ;;  %v1787_v49 = vshrl.u32 %v357_v48, 7 }
  0xaa   : > { %v359_v50 = vsub.s32 0, %v1787_v49  ;;  %v363_v52 = vsub.s32 1, %v1787_v49 }
  0xab   : > { %560 = vmatmul.mubr.bf16.vlgmr.msra.gmra.mrb[0].mxu0 %v307_v56  ;;  %889 = vmatpush1.bf16.msra.mxu1 %v1365_v45 }
  0xac   : > { %569 = vmatprep.mubr.bf16.mxu0 %v310_v57  ;;  %890 = vmatprep.subr.bf16.mxu1 %v1366_v46  ;;  %v1796_v53 = vrot.slane %v355_v51, %v359_v50  ;;  %v1800_v55 = vrot.slane %v355_v51, %v363_v52 }
  0xaf   : > { %891 = vmatpush1.bf16.msra.mxu1 %v1368_v47 }
  0xb3   : > { %570 = vmatmul.mubr.bf16.gmra.mrb[4].mxu0 %v309_v2 }
  0xb4   : > { %579 = vmatprep.mubr.bf16.mxu0 %v312_v3 }
  0xbb   : > { %580 = vmatmul.mubr.bf16.gmra.mrb[8].mxu0 %v311_v12 }
  0xbc   : > { %589 = vmatprep.mubr.bf16.mxu0 %v314_v13 }
  0xc3   : > { %590 = vmatmul.mubr.bf16.gmra.mrb[12].mxu0 %v313_v21 }
  0xc4   : > { %599 = vmatprep.mubr.bf16.mxu0 %v316_v22 }
  0xcb   : > { %600 = vmatmul.mubr.bf16.gmra.mrb[16].mxu0 %v315_v27 }
  0xcc   : > { %609 = vmatprep.mubr.bf16.mxu0 %v318_v28 }
  0xd3   : > { %610 = vmatmul.mubr.bf16.gmra.mrb[20].mxu0 %v317_v33 }
  0xd4   : > { %619 = vmatprep.mubr.bf16.mxu0 %v320_v34 }
  0xdb   : > { %620 = vmatmul.mubr.bf16.gmra.mrb[24].mxu0 %v319_v39 }
  0xdc   : > { %629 = vmatprep.mubr.bf16.mxu0 %v322_v40 }
  0xe3   : > { %630 = vmatmul.mubr.bf16.gmra.mrb[28].mxu0 %v321_v43 }
 0x17e   : > { %v561_v54 = vpop.f32.mrb[0].mxu0 }
 0x17f   : > { %v563_v56 = vpop.f32.mrb[1].mxu0  ;;  %v562_v58 = vadd.f32 %v561_v54, %v1796_v53 }
 0x180   : > { %v565_v57 = vpop.f32.mrb[2].mxu0  ;;  %v564_v61 = vadd.f32 %v563_v56, %v1800_v55 }
 0x181   : > { %v566_v59 = vadd.f32 %v565_v57, %v1796_v53  ;;  %v567_v60 = vpop.f32.mrb[3].mxu0 }
 0x182   : > { %v568_v62 = vadd.f32 %v567_v60, %v1800_v55 }
 0x183   : > { %v640_v63 = vpack.c.bf16 %v566_v59, %v562_v58 }
 0x184   : > { %v641_v0 = vpack.c.bf16 %v568_v62, %v564_v61 }
 0x186   : > { %v571_v1 = vpop.f32.mrb[4].mxu0  ;;  %892 = vmatprep.mubr.bf16.mxu1 %v641_v0 }
 0x187   : > { %v573_v2 = vpop.f32.mrb[5].mxu0  ;;  %893 = vmatmul.mubr.bf16.vlgmr.msra.gmra.mrb[0].mxu1 %v640_v63  ;;  %v572_v4 = vadd.f32 %v571_v1, %v1796_v53 }
 0x188   : > { %v575_v3 = vpop.f32.mrb[6].mxu0  ;;  %v574_v7 = vadd.f32 %v573_v2, %v1800_v55 }
 0x189   : > { %v576_v5 = vadd.f32 %v575_v3, %v1796_v53  ;;  %v577_v6 = vpop.f32.mrb[7].mxu0 }
 0x18a   : > { %v578_v8 = vadd.f32 %v577_v6, %v1800_v55 }
 0x18b   : > { %v642_v9 = vpack.c.bf16 %v576_v5, %v572_v4 }
 0x18c   : > { %v643_v10 = vpack.c.bf16 %v578_v8, %v574_v7 }
 0x18e   : > { %v581_v11 = vpop.f32.mrb[8].mxu0  ;;  %902 = vmatprep.mubr.bf16.mxu1 %v643_v10 }
 0x18f   : > { %v583_v12 = vpop.f32.mrb[9].mxu0  ;;  %903 = vmatmul.mubr.bf16.gmra.mrb[4].mxu1 %v642_v9  ;;  %v582_v14 = vadd.f32 %v581_v11, %v1796_v53 }
 0x190   : > { %v585_v13 = vpop.f32.mrb[10].mxu0  ;;  %v584_v17 = vadd.f32 %v583_v12, %v1800_v55  ;;  %v688_v12 = vld [vmem:[%s1968_s4] sm:$0x3] }
 0x191   : > { %v586_v15 = vadd.f32 %v585_v13, %v1796_v53  ;;  %v587_v16 = vpop.f32.mrb[11].mxu0  ;;  %v1839_v13 = vrot.slane %v688_v12, %v359_v50 }
 0x192   : > { %v588_v18 = vadd.f32 %v587_v16, %v1800_v55 }
 0x193   : > { %v644_v19 = vpack.c.bf16 %v586_v15, %v582_v14 }
 0x194   : > { %v645_v20 = vpack.c.bf16 %v588_v18, %v584_v17 }
 0x196   : > { %v591_v21 = vpop.f32.mrb[12].mxu0  ;;  %912 = vmatprep.mubr.bf16.mxu1 %v645_v20 }
 0x197   : > { %v593_v22 = vpop.f32.mrb[13].mxu0  ;;  %913 = vmatmul.mubr.bf16.gmra.mrb[8].mxu1 %v644_v19  ;;  %v592_v24 = vadd.f32 %v591_v21, %v1796_v53 }
 0x198   : > { %v595_v23 = vpop.f32.mrb[14].mxu0  ;;  %v594_v27 = vadd.f32 %v593_v22, %v1800_v55 }
 0x199   : > { %v596_v25 = vadd.f32 %v595_v23, %v1796_v53  ;;  %v597_v26 = vpop.f32.mrb[15].mxu0 }
 0x19a   : > { %v598_v28 = vadd.f32 %v597_v26, %v1800_v55 }
 0x19b   : > { %v646_v29 = vpack.c.bf16 %v596_v25, %v592_v24 }
 0x19c   : > { %v647_v30 = vpack.c.bf16 %v598_v28, %v594_v27 }
 0x19e   : > { %v601_v31 = vpop.f32.mrb[16].mxu0  ;;  %922 = vmatprep.mubr.bf16.mxu1 %v647_v30 }
 0x19f   : > { %v603_v32 = vpop.f32.mrb[17].mxu0  ;;  %923 = vmatmul.mubr.bf16.gmra.mrb[12].mxu1 %v646_v29  ;;  %v602_v34 = vadd.f32 %v601_v31, %v1796_v53 }
 0x1a0   : > { %v605_v33 = vpop.f32.mrb[18].mxu0  ;;  %v604_v37 = vadd.f32 %v603_v32, %v1800_v55 }
 0x1a1   : > { %v606_v35 = vadd.f32 %v605_v33, %v1796_v53  ;;  %v607_v36 = vpop.f32.mrb[19].mxu0 }
 0x1a2   : > { %v608_v38 = vadd.f32 %v607_v36, %v1800_v55 }
 0x1a3   : > { %v648_v39 = vpack.c.bf16 %v606_v35, %v602_v34 }
 0x1a4   : > { %v649_v40 = vpack.c.bf16 %v608_v38, %v604_v37 }
 0x1a6   : > { %v611_v41 = vpop.f32.mrb[20].mxu0  ;;  %932 = vmatprep.mubr.bf16.mxu1 %v649_v40 }
 0x1a7   : > { %v613_v42 = vpop.f32.mrb[21].mxu0  ;;  %933 = vmatmul.mubr.bf16.gmra.mrb[16].mxu1 %v648_v39  ;;  %v612_v44 = vadd.f32 %v611_v41, %v1796_v53 }
 0x1a8   : > { %v615_v43 = vpop.f32.mrb[22].mxu0  ;;  %v614_v47 = vadd.f32 %v613_v42, %v1800_v55 }
 0x1a9   : > { %v616_v45 = vadd.f32 %v615_v43, %v1796_v53  ;;  %v617_v46 = vpop.f32.mrb[23].mxu0 }
 0x1aa   : > { %v618_v48 = vadd.f32 %v617_v46, %v1800_v55 }
 0x1ab   : > { %v650_v51 = vpack.c.bf16 %v616_v45, %v612_v44 }
 0x1ac   : > { %v651_v54 = vpack.c.bf16 %v618_v48, %v614_v47 }
 0x1ae   : > { %v621_v56 = vpop.f32.mrb[24].mxu0  ;;  %942 = vmatprep.mubr.bf16.mxu1 %v651_v54 }
 0x1af   : > { %v623_v57 = vpop.f32.mrb[25].mxu0  ;;  %943 = vmatmul.mubr.bf16.gmra.mrb[20].mxu1 %v650_v51  ;;  %v622_v59 = vadd.f32 %v621_v56, %v1796_v53 }
 0x1b0   : > { %v625_v58 = vpop.f32.mrb[26].mxu0  ;;  %v624_v62 = vadd.f32 %v623_v57, %v1800_v55 }
 0x1b1   : > { %v626_v60 = vadd.f32 %v625_v58, %v1796_v53  ;;  %v627_v61 = vpop.f32.mrb[27].mxu0 }
 0x1b2   : > { %v628_v63 = vadd.f32 %v627_v61, %v1800_v55 }
 0x1b3   : > { %v652_v0 = vpack.c.bf16 %v626_v60, %v622_v59 }
 0x1b4   : > { %v653_v1 = vpack.c.bf16 %v628_v63, %v624_v62 }
 0x1b6   : > { %v631_v2 = vpop.f32.mrb[28].mxu0  ;;  %952 = vmatprep.mubr.bf16.mxu1 %v653_v1 }
 0x1b7   : > { %v633_v3 = vpop.f32.mrb[29].mxu0  ;;  %953 = vmatmul.mubr.bf16.gmra.mrb[24].mxu1 %v652_v0  ;;  %v632_v5 = vadd.f32 %v631_v2, %v1796_v53 }
 0x1b8   : > { %v635_v4 = vpop.f32.mrb[30].mxu0  ;;  %v634_v8 = vadd.f32 %v633_v3, %v1800_v55 }
 0x1b9   : > { %v636_v6 = vadd.f32 %v635_v4, %v1796_v53  ;;  %v637_v7 = vpop.f32.mrb[31].mxu0  ;;  %v1843_v53 = vrot.slane %v688_v12, %v363_v52 }
 0x1ba   : > { %v638_v9 = vadd.f32 %v637_v7, %v1800_v55 }
 0x1bb   : > { %v654_v10 = vpack.c.bf16 %v636_v6, %v632_v5 }
 0x1bc   : > { %v655_v11 = vpack.c.bf16 %v638_v9, %v634_v8 }
 0x1be   : > { %962 = vmatprep.mubr.bf16.mxu1 %v655_v11 }
 0x1bf   : > { %963 = vmatmul.mubr.bf16.gmra.mrb[28].mxu1 %v654_v10 }
 0x25a   : > { %v894_v14 = vpop.f32.mrb[0].mxu1 }
 0x25b   : > { %v895_v15 = vadd.f32 %v894_v14, %v1839_v13  ;;  %v896_v55 = vpop.f32.mrb[1].mxu1 }
 0x25c   : > { %v897_v16 = vadd.f32 %v896_v55, %v1843_v53  ;;  %v898_v17 = vpop.f32.mrb[2].mxu1 }
 0x25d   : > { %973 = vst [vmem:[%s1849_s11] sm:$0xff] %v895_v15  ;;  %v899_v49 = vadd.f32 %v898_v17, %v1839_v13  ;;  %v900_v50 = vpop.f32.mrb[3].mxu1 }
 0x25e   : > { %974 = vst [vmem:[%s1849_s11 + $0x8] sm:$0xff] %v897_v16  ;;  %v901_v52 = vadd.f32 %v900_v50, %v1843_v53 }
 0x25f   : > { %975 = vst [vmem:[%s1849_s11 + $0x10] sm:$0xff] %v899_v49 }
 0x260   : > { %976 = vst [vmem:[%s1849_s11 + $0x18] sm:$0xff] %v901_v52 }
 0x262   : > { %v904_v18 = vpop.f32.mrb[4].mxu1 }
 0x263   : > { %v905_v19 = vadd.f32 %v904_v18, %v1839_v13  ;;  %v906_v20 = vpop.f32.mrb[5].mxu1 }
 0x264   : > { %v907_v21 = vadd.f32 %v906_v20, %v1843_v53  ;;  %v908_v22 = vpop.f32.mrb[6].mxu1 }
 0x265   : > { %977 = vst [vmem:[%s1849_s11 + $0x20] sm:$0xff] %v905_v19  ;;  %v909_v23 = vadd.f32 %v908_v22, %v1839_v13  ;;  %v910_v24 = vpop.f32.mrb[7].mxu1 }
 0x266   : > { %978 = vst [vmem:[%s1849_s11 + $0x28] sm:$0xff] %v907_v21  ;;  %v911_v25 = vadd.f32 %v910_v24, %v1843_v53 }
 0x267   : > { %979 = vst [vmem:[%s1849_s11 + $0x30] sm:$0xff] %v909_v23 }
 0x268   : > { %980 = vst [vmem:[%s1849_s11 + $0x38] sm:$0xff] %v911_v25 }
 0x26a   : > { %v914_v26 = vpop.f32.mrb[8].mxu1 }
 0x26b   : > { %v915_v27 = vadd.f32 %v914_v26, %v1839_v13  ;;  %v916_v28 = vpop.f32.mrb[9].mxu1 }
 0x26c   : > { %v917_v29 = vadd.f32 %v916_v28, %v1843_v53  ;;  %v918_v30 = vpop.f32.mrb[10].mxu1 }
 0x26d   : > { %981 = vst [vmem:[%s1849_s11 + $0x40] sm:$0xff] %v915_v27  ;;  %v919_v31 = vadd.f32 %v918_v30, %v1839_v13  ;;  %v920_v32 = vpop.f32.mrb[11].mxu1 }
 0x26e   : > { %982 = vst [vmem:[%s1849_s11 + $0x48] sm:$0xff] %v917_v29  ;;  %v921_v33 = vadd.f32 %v920_v32, %v1843_v53 }
 0x26f   : > { %983 = vst [vmem:[%s1849_s11 + $0x50] sm:$0xff] %v919_v31 }
 0x270   : > { %984 = vst [vmem:[%s1849_s11 + $0x58] sm:$0xff] %v921_v33 }
 0x272   : > { %v924_v34 = vpop.f32.mrb[12].mxu1 }
 0x273   : > { %v925_v35 = vadd.f32 %v924_v34, %v1839_v13  ;;  %v926_v36 = vpop.f32.mrb[13].mxu1 }
 0x274   : > { %v927_v37 = vadd.f32 %v926_v36, %v1843_v53  ;;  %v928_v38 = vpop.f32.mrb[14].mxu1 }
 0x275   : > { %985 = vst [vmem:[%s1849_s11 + $0x60] sm:$0xff] %v925_v35  ;;  %v929_v39 = vadd.f32 %v928_v38, %v1839_v13  ;;  %v930_v40 = vpop.f32.mrb[15].mxu1 }
 0x276   : > { %986 = vst [vmem:[%s1849_s11 + $0x68] sm:$0xff] %v927_v37  ;;  %v931_v41 = vadd.f32 %v930_v40, %v1843_v53 }
 0x277   : > { %987 = vst [vmem:[%s1849_s11 + $0x70] sm:$0xff] %v929_v39 }
 0x278   : > { %988 = vst [vmem:[%s1849_s11 + $0x78] sm:$0xff] %v931_v41 }
 0x27a   : > { %v934_v42 = vpop.f32.mrb[16].mxu1 }
 0x27b   : > { %v935_v43 = vadd.f32 %v934_v42, %v1839_v13  ;;  %v936_v44 = vpop.f32.mrb[17].mxu1 }
 0x27c   : > { %v937_v45 = vadd.f32 %v936_v44, %v1843_v53  ;;  %v938_v46 = vpop.f32.mrb[18].mxu1 }
 0x27d   : > { %989 = vst [vmem:[%s1849_s11 + $0x80] sm:$0xff] %v935_v43  ;;  %v939_v47 = vadd.f32 %v938_v46, %v1839_v13  ;;  %v940_v48 = vpop.f32.mrb[19].mxu1 }
 0x27e   : > { %990 = vst [vmem:[%s1849_s11 + $0x88] sm:$0xff] %v937_v45  ;;  %v941_v51 = vadd.f32 %v940_v48, %v1843_v53 }
 0x27f   : > { %991 = vst [vmem:[%s1849_s11 + $0x90] sm:$0xff] %v939_v47 }
 0x280   : > { %992 = vst [vmem:[%s1849_s11 + $0x98] sm:$0xff] %v941_v51 }
 0x282   : > { %v944_v54 = vpop.f32.mrb[20].mxu1 }
 0x283   : > { %v945_v56 = vadd.f32 %v944_v54, %v1839_v13  ;;  %v946_v57 = vpop.f32.mrb[21].mxu1 }
 0x284   : > { %v947_v58 = vadd.f32 %v946_v57, %v1843_v53  ;;  %v948_v59 = vpop.f32.mrb[22].mxu1 }
 0x285   : > { %993 = vst [vmem:[%s1849_s11 + $0xa0] sm:$0xff] %v945_v56  ;;  %v949_v60 = vadd.f32 %v948_v59, %v1839_v13  ;;  %v950_v61 = vpop.f32.mrb[23].mxu1 }
 0x286   : > { %994 = vst [vmem:[%s1849_s11 + $0xa8] sm:$0xff] %v947_v58  ;;  %v951_v62 = vadd.f32 %v950_v61, %v1843_v53 }
 0x287   : > { %995 = vst [vmem:[%s1849_s11 + $0xb0] sm:$0xff] %v949_v60 }
 0x288   : > { %996 = vst [vmem:[%s1849_s11 + $0xb8] sm:$0xff] %v951_v62 }
 0x28a   : > { %v954_v63 = vpop.f32.mrb[24].mxu1 }
 0x28b   : > { %v955_v0 = vadd.f32 %v954_v63, %v1839_v13  ;;  %v956_v1 = vpop.f32.mrb[25].mxu1 }
 0x28c   : > { %v957_v2 = vadd.f32 %v956_v1, %v1843_v53  ;;  %v958_v3 = vpop.f32.mrb[26].mxu1 }
 0x28d   : > { %997 = vst [vmem:[%s1849_s11 + $0xc0] sm:$0xff] %v955_v0  ;;  %v959_v4 = vadd.f32 %v958_v3, %v1839_v13  ;;  %v960_v5 = vpop.f32.mrb[27].mxu1 }
 0x28e   : > { %998 = vst [vmem:[%s1849_s11 + $0xc8] sm:$0xff] %v957_v2  ;;  %v961_v6 = vadd.f32 %v960_v5, %v1843_v53 }
 0x28f   : > { %999 = vst [vmem:[%s1849_s11 + $0xd0] sm:$0xff] %v959_v4 }
 0x290   : > { %1000 = vst [vmem:[%s1849_s11 + $0xd8] sm:$0xff] %v961_v6 }
 0x292   : > { %v964_v7 = vpop.f32.mrb[28].mxu1 }
 0x293   : > { %v965_v8 = vadd.f32 %v964_v7, %v1839_v13  ;;  %v966_v9 = vpop.f32.mrb[29].mxu1 }
 0x294   : > { %v967_v10 = vadd.f32 %v966_v9, %v1843_v53  ;;  %v968_v11 = vpop.f32.mrb[30].mxu1 }
 0x295   : > { %1001 = vst [vmem:[%s1849_s11 + $0xe0] sm:$0xff] %v965_v8  ;;  %v969_v12 = vadd.f32 %v968_v11, %v1839_v13  ;;  %v970_v14 = vpop.f32.mrb[31].mxu1 }
 0x296   : > { %1002 = vst [vmem:[%s1849_s11 + $0xe8] sm:$0xff] %v967_v10  ;;  %v971_v15 = vadd.f32 %v970_v14, %v1843_v53 }
 0x297   : > { %1003 = vst [vmem:[%s1849_s11 + $0xf0] sm:$0xff] %v969_v12 }
 0x298   : > { %1004 = vst [vmem:[%s1849_s11 + $0xf8] sm:$0xff] %v971_v15 }
 0x299   : > { %1468 = shalt.err (!%p1465_p2)
}
 0x29a   : > { %s1469_s6 = scalar_lea.hbm %s1914_s9, 4096  ;;  %s1473_s8 = scalar_lea.hbm %s1969_s5, 8192 }
 0x29b   : > { %p1470_p13 = scmp.ne.s32.totalorder %s1914_s9, %s1469_s6  ;;  %p1474_p4 = scmp.lt.u32.totalorder %s1914_s9, %s1969_s5 }
 0x29c   : > { %p1475_p5 = scmp.lt.u32.totalorder %s1473_s8, %s1469_s6  ;;  %p1477_p11 = scmp.lt.u32.totalorder %s1469_s6, %s1914_s9 }
 0x29d   : > { %p1471_p6 = pnand %p1470_p13, %p1983_p0 }
 0x29e   : > { %p1476_p8 = por %p1475_p5, %p1474_p4 }
 0x29f   : > { %p1472_p10 = pneg %p1471_p6 }
 0x2a0   : > { %p1478_p1 = por %p1477_p11, %p1476_p8 }
 0x2a2   : > { %p1479_p3 = pnand %p1478_p1, %p1472_p10 }
 0x2a4   : > { %1482 = shalt.err (!%p1479_p3)
}
 0x2a5   : > { %s1535_s28 = smov 256   ;;  %s1536_s15 = smov 16  }
 0x2a6   : > { %1210 = dma.vmem_to_hbm [thread:$0]  (%p1983_p0), %s1916_s30, 4096, %s1914_s9, %s1006_s22, %s1535_s28, %s1535_s28, %s1536_s15  }
 0x2a7 PF: > { %s1035_s16 = sand.u32 1, %s1513_s18   ;;  %p1984_p7 = scmp.ne.s32.totalorder %s1974_s25, 0 }
 0x2a8   : > { %p1985_p9 = scmp.ge.s32.totalorder %s1525_s21, 2  ;;  %s1036_s12 = scalar_lea.sflag [#allocation4], %s1035_s16 }
 0x2aa   : > { %p1224_p12 = pnand %p1985_p9, %p1984_p7 }
 0x2ac   : > { %1508 = dma.done.wait (!%p1224_p12), %s1036_s12, 4096  }
 0x2ad   : > { %1510 = vsyncadd (!%p1224_p12), %s1036_s12, 4294963200  ;;  %p19_p2 = scmp.ge.s32.totalorder %s1677_s14, 4   ;;  %s1986_s18 = smov %s1517_s19 }
 0x2ae   : > { %s1987_s19 = smov %s1521_s20  ;;  %s1988_s20 = smov %s1693_s27 }
 0x2af   : > { %s1989_s21 = smov %s1677_s14  ;;  %21 = sbr.rel (!%p19_p2) target bundleno = 6 (0x6), region = 93 }
 0x2b6   :  { %1041 = vsyncpa [#allocation3], 1 }
 0x2b7   :  { %1043 = vsyncpa [#allocation3 + $0x1], 1 }
 0x2b8   :  { %1044 = vsyncpa [#allocation6], 1 }
 0x2b9   :  { %1045 = vsyncpa [#allocation4], 1 }
 0x2ba   :  { %1047 = vsyncpa [#allocation4 + $0x1], 1 }

</bundles_post_ra>
